<compile_context>
chip_gen: v7x
topology: tpu7x:2x2x1
jax: 0.10.0
libtpu: 0.0.40
codegen_flags: <defaults>
</compile_context>

<pallas_src>
import functools

import jax
import jax.numpy as jnp
from jax.experimental import pallas as pl
from jax.experimental.pallas import tpu as pltpu

_MIB = 1024 * 1024


def _vmem_limits():
    """Generation-aware VMEM numbers (trace-time query, plain Python ints).

    Returns (vmem_limit_bytes, buffer_budget_bytes):
      v7x  (64 MiB physical / TensorCore) -> limit 56 MiB, budget 48 MiB
      v5e / v6e (128 MiB physical)        -> limit 112 MiB, budget 98 MiB
    """
    try:
        phys = int(pltpu.get_tpu_info().vmem_capacity_bytes)
    except Exception:
        # Unknown chip / query unavailable: assume the smallest (v7x, 64 MiB).
        phys = 64 * _MIB
    limit = phys - max(8 * _MIB, phys // 8)       # headroom for compiler scratch
    budget = limit - max(8 * _MIB, limit // 8)    # headroom for f32 intermediates
    return limit, budget


def _pos_emb_kernel(x_ref, wt_ref, b_ref, o_ref, *, col_tile):
    """One (row, column) tile of  o = x + (x @ Wt + b).

    x_ref  : (tm, D)   full-width rows of x
    wt_ref : (D, tn)   pre-transposed weight column block (tn == D if col_tile is None)
    b_ref  : (1, tn)
    o_ref  : (tm, tn)
    """
    x = x_ref[...]
    wt = wt_ref[...]
    lhs = x if x.dtype == wt.dtype else x.astype(wt.dtype)
    pe = jnp.dot(lhs, wt, preferred_element_type=jnp.float32)       # MXU, f32 acc
    pe = pe + b_ref[...].astype(jnp.float32)                        # bias in f32
    if col_tile is None:
        x_res = x
    else:
        # Residual needs only the column block this tile produces.
        off = pl.multiple_of(pl.program_id(1) * col_tile, col_tile)
        x_res = x_ref[:, pl.ds(off, col_tile)]
    o_ref[...] = (x_res.astype(jnp.float32) + pe).astype(o_ref.dtype)


def prepare_positional_embedding_params(weight, bias, *, bf16_matmul=False):
    """One-time parameter prep — call OUTSIDE the hot path and reuse the result.

    The transpose (and optional bf16 cast) is a D^2 HBM read+write that should
    not be paid on every forward call (it can rival the kernel's own traffic
    for decode-style shapes).
    """
    wt = jnp.asarray(weight).T                 # (in, out): MXU contracts directly
    if bf16_matmul:
        wt = wt.astype(jnp.bfloat16)           # halves weight DMA / VMEM
    b2 = jnp.asarray(bias).reshape(1, -1)
    return wt, b2


@functools.partial(jax.jit, static_argnames=("block_m", "column_block"))
def positional_embedding_prepared(x, wt, b2, *, block_m=512, column_block=None):
    """x: [B, S, D]; wt: [D, D] pre-transposed (in, out); b2: [1, D]."""
    B, S, D = x.shape
    M = B * S
    x2 = x.reshape(M, D)

    x_bytes = jnp.dtype(x.dtype).itemsize
    w_bytes = jnp.dtype(wt.dtype).itemsize
    b_bytes = jnp.dtype(b2.dtype).itemsize
    o_bytes = x_bytes

    vmem_limit, vmem_budget = _vmem_limits()

    # Row tile (multiple of 8 unless it is the full row extent).
    tm = M if M <= block_m else max(8, (block_m // 8) * 8)

    w_resident = D * D * w_bytes + D * b_bytes   # single-buffered weight + bias

    # ---- tiling strategy --------------------------------------------------
    # Path A (resident weight): 1-D grid over rows; the (D, D) weight stays in
    #   VMEM (single-buffered) for the whole call.
    # Path B (column-tiled weight): for large D the resident weight would blow
    #   the VMEM budget (or force tiny row tiles), so also tile the weight's
    #   output-feature axis.  This splits N (not K): no accumulator needed and
    #   both grid axes stay "parallel".
    col_tile = None
    if column_block is not None:
        if column_block % 128 != 0 or D % column_block != 0:
            raise ValueError("column_block must be a multiple of 128 that divides D")
        if column_block < D:
            col_tile = int(column_block)
    elif D % 128 == 0 and w_resident > vmem_budget // 2:
        for cand in (512, 256, 128):
            if cand < D and D % cand == 0:
                col_tile = cand
                break
    # TODO(synk): for huge D that is NOT a multiple of 128 the resident-weight
    # path may still exceed the VMEM budget; a K-split with an f32 accumulator
    # would be needed there (not implemented — relies on vmem_limit headroom).

    if col_tile is None:
        # Resident W/b + double-buffered x & out tiles + ~one f32 intermediate.
        def est(t):
            return w_resident + t * D * (2 * x_bytes + 2 * o_bytes + 4)

        while tm > 128 and est(tm) > vmem_budget and (tm // 2) % 8 == 0:
            tm //= 2

        grid = (pl.cdiv(M, tm),)
        in_specs = [
            pl.BlockSpec((tm, D), lambda i: (i, 0)),                 # x rows
            pl.BlockSpec((D, D), lambda i: (0, 0),
                         pipeline_mode=pl.Buffered(1)),              # grid-invariant W^T
            pl.BlockSpec((1, D), lambda i: (0, 0),
                         pipeline_mode=pl.Buffered(1)),              # grid-invariant bias
        ]
        out_specs = pl.BlockSpec((tm, D), lambda i: (i, 0))
        dim_sem = ("parallel",)
    else:
        tn = col_tile

        def est(t):
            return (2 * t * D * x_bytes          # x row tile (reused across j)
                    + 2 * D * tn * w_bytes       # weight column block
                    + 2 * t * tn * o_bytes       # output tile
                    + 2 * t * tn * 4)            # f32 epilogue intermediates

        while tm > 128 and est(tm) > vmem_budget and (tm // 2) % 8 == 0:
            tm //= 2

        grid = (pl.cdiv(M, tm), D // tn)
        # x's index_map ignores j (the inner, fastest axis) so Pallas does not
        # re-DMA the row tile for every weight column block.
        in_specs = [
            pl.BlockSpec((tm, D), lambda i, j: (i, 0)),
            pl.BlockSpec((D, tn), lambda i, j: (0, j)),
            pl.BlockSpec((1, tn), lambda i, j: (0, j)),
        ]
        out_specs = pl.BlockSpec((tm, tn), lambda i, j: (i, j))
        dim_sem = ("parallel", "parallel")

    cost = pl.CostEstimate(
        flops=2 * M * D * D,
        transcendentals=0,
        bytes_accessed=M * D * (x_bytes + o_bytes) + D * D * w_bytes + D * b_bytes,
    )

    out = pl.pallas_call(
        functools.partial(_pos_emb_kernel, col_tile=col_tile),
        out_shape=jax.ShapeDtypeStruct((M, D), x.dtype),
        grid_spec=pltpu.PrefetchScalarGridSpec(
            num_scalar_prefetch=0,
            grid=grid,
            in_specs=in_specs,
            out_specs=out_specs,
        ),
        compiler_params=pltpu.CompilerParams(
            dimension_semantics=dim_sem,
            vmem_limit_bytes=vmem_limit,
        ),
        cost_estimate=cost,
    )(x2, wt, b2)

    return out.reshape(B, S, D)


def positional_embedding(x, weight, bias, *, block_m=512, bf16_matmul=False,
                         column_block=None):
    """y = x + (x @ W^T + b)  — matches torch nn.Linear(d, d) + residual.

    Convenience wrapper.  For hot loops, call
    prepare_positional_embedding_params() once and reuse
    positional_embedding_prepared() so the weight transpose is not repeated.
    bf16_matmul=True trades exact f32-Linear numerics for ~3x MXU throughput
    and half the weight DMA bytes (accumulation stays f32).
    """
    wt, b2 = prepare_positional_embedding_params(weight, bias, bf16_matmul=bf16_matmul)
    return positional_embedding_prepared(x, wt, b2, block_m=block_m,
                                         column_block=column_block)


if __name__ == "__main__":
    # Small shapes consistent with the module: batch=2, seq=8, d_model=32.
    B, S, D = 2, 8, 32

    key = jax.random.PRNGKey(0)
    kx, kw, kb = jax.random.split(key, 3)

    x = jax.random.normal(kx, (B, S, D), dtype=jnp.float32)
    # Deterministic "Linear(d_model, d_model)" params (synthetic init, not a checkpoint).
    weight = jax.random.normal(kw, (D, D), dtype=jnp.float32) * (1.0 / jnp.sqrt(D))
    bias = jax.random.normal(kb, (D,), dtype=jnp.float32) * 0.01

    ref = x + (jnp.einsum("bsd,od->bso", x, weight) + bias)

    # f32 path — exact semantics of the PyTorch module.
    out = positional_embedding(x, weight, bias)
    jax.block_until_ready(out)
    assert out.shape == (B, S, D)
    assert jnp.allclose(out, ref, atol=1e-5, rtol=1e-5)

    # bf16-operand path (f32 accumulate) — looser tolerance.
    out_bf16 = positional_embedding(x, weight, bias, bf16_matmul=True)
    jax.block_until_ready(out_bf16)
    assert jnp.allclose(out_bf16, ref, atol=3e-2, rtol=3e-2)

    # Exercise the column-tiled (large-D) path at a small, safe size.
    D2 = 256
    kx2, kw2, kb2 = jax.random.split(jax.random.PRNGKey(1), 3)
    x_big = jax.random.normal(kx2, (B, S, D2), dtype=jnp.float32)
    w_big = jax.random.normal(kw2, (D2, D2), dtype=jnp.float32) * (1.0 / jnp.sqrt(D2))
    b_big = jax.random.normal(kb2, (D2,), dtype=jnp.float32) * 0.01
    ref_big = x_big + (jnp.einsum("bsd,od->bso", x_big, w_big) + b_big)
    out_big = positional_embedding(x_big, w_big, b_big, column_block=128)
    jax.block_until_ready(out_big)
    assert jnp.allclose(out_big, ref_big, atol=1e-4, rtol=1e-4)

    print("KERNEL_OK")
</pallas_src>

<mosaic_0001>
module attributes {stable_mosaic.version = 11 : i64} {
  func.func @_pos_emb_kernel(%arg0: i32, %arg1: memref<16x32xf32, #tpu.memory_space<vmem>>, %arg2: memref<32x32xf32, #tpu.memory_space<vmem>>, %arg3: memref<1x32xf32, #tpu.memory_space<vmem>>, %arg4: memref<16x32xf32, #tpu.memory_space<vmem>>) attributes {dimension_semantics = [#tpu.dimension_semantics<parallel>], iteration_bounds = array<i64: 1>, scalar_prefetch = 0 : i64, scratch_operands = 0 : i64, tpu.core_type = #tpu.core_type<tc>, window_params = [{transform_indices = @transform_0, window_bounds = array<i64: 16, 32>}, {pipeline_mode = #tpu.pipeline_mode<synchronous>, transform_indices = @transform_1, window_bounds = array<i64: 32, 32>}, {pipeline_mode = #tpu.pipeline_mode<synchronous>, transform_indices = @transform_2, window_bounds = array<i64: 1, 32>}, {transform_indices = @transform_3, window_bounds = array<i64: 16, 32>}]} {
    %c0 = arith.constant 0 : index
    %c0_0 = arith.constant 0 : index
    %0 = vector.load %arg1[%c0, %c0_0] : memref<16x32xf32, #tpu.memory_space<vmem>>, vector<16x32xf32>
    %c0_1 = arith.constant 0 : index
    %c0_2 = arith.constant 0 : index
    %1 = vector.load %arg2[%c0_1, %c0_2] : memref<32x32xf32, #tpu.memory_space<vmem>>, vector<32x32xf32>
    %cst = arith.constant dense<0.000000e+00> : vector<16x32xf32>
    %2 = tpu.matmul %0, %1, %cst {dimension_numbers = #tpu.dot_dimension_numbers<[1], [0], [0], [1], [0, 0, 1, 1], [], []>} : vector<16x32xf32>, vector<32x32xf32>, vector<16x32xf32> -> vector<16x32xf32>
    %c0_3 = arith.constant 0 : index
    %c0_4 = arith.constant 0 : index
    %3 = vector.load %arg3[%c0_3, %c0_4] : memref<1x32xf32, #tpu.memory_space<vmem>>, vector<1x32xf32>
    %4 = vector.broadcast %3 : vector<1x32xf32> to vector<16x32xf32>
    %5 = arith.addf %2, %4 : vector<16x32xf32>
    %6 = arith.addf %0, %5 : vector<16x32xf32>
    %c0_5 = arith.constant 0 : index
    %c0_6 = arith.constant 0 : index
    %7 = vector.load %arg4[%c0_5, %c0_6] : memref<16x32xf32, #tpu.memory_space<vmem>>, vector<16x32xf32>
    tpu.vector_store %arg4[%c0_5, %c0_6], %6 {strides = array<i32>} : memref<16x32xf32, #tpu.memory_space<vmem>>, vector<16x32xf32>,
    return
  }
  func.func @transform_0(%arg0: i32) -> (i32, i32) {
    %c0_i32 = arith.constant 0 : i32
    %c0_i32_0 = arith.constant 0 : i32
    return %arg0, %c0_i32 : i32, i32
  }
  func.func @transform_1(%arg0: i32) -> (i32, i32) {
    %c0_i32 = arith.constant 0 : i32
    %c0_i32_0 = arith.constant 0 : i32
    %c0_i32_1 = arith.constant 0 : i32
    return %c0_i32, %c0_i32_0 : i32, i32
  }
  func.func @transform_2(%arg0: i32) -> (i32, i32) {
    %c0_i32 = arith.constant 0 : i32
    %c0_i32_0 = arith.constant 0 : i32
    %c0_i32_1 = arith.constant 0 : i32
    return %c0_i32, %c0_i32_0 : i32, i32
  }
  func.func @transform_3(%arg0: i32) -> (i32, i32) {
    %c0_i32 = arith.constant 0 : i32
    %c0_i32_0 = arith.constant 0 : i32
    return %arg0, %c0_i32 : i32, i32
  }
}

</mosaic_0001>

<bundles_post_ra>
// kernel: positional_embedding_prepared.1
= control target key start
LH: loop header
LB: loop body
LE: loop exit
PB: predicated region body
PF: predicated region fallthrough
CT: control target
= control target key end

     0   :  { %8 = vsyncpa [#allocation3], 0  ;;  %s342_s0 = inlined_call_operand.hbm [shape: f32[16,32], index: 0, kind: input, shape index: {}]   ;;  %s343_s1 = inlined_call_operand.hbm [shape: f32[32,32], index: 1, kind: input, shape index: {}]   ;;  %s344_s2 = inlined_call_operand.vmem [shape: f32[1,32], index: 2, kind: input, shape index: {}]   ;;  %s345_s3 = inlined_call_operand.hbm [shape: f32[16,32], index: 3, kind: output, shape index: {}]  }
   0x1   :  { %9 = vsyncpa [#allocation6], 0 }
   0x2   :  { %10 = vsyncpa [#allocation4], 0  ;;  %s265_s12 = smov [#allocation2]   ;;  %s193_s16 = scalar_lea.hbm %s342_s0, 256 }
   0x3   :  { %s16_s13 = sshll.u32 %s265_s12, 4  ;;  %p194_p0 = scmp.ne.s32.totalorder %s342_s0, %s193_s16  ;;  %s17_s13 = int_to_ptr.vmem [resolvable:$true] %s16_s13 }
   0x4   :  { %p197_p1 = scmp.lt.u32.totalorder %s193_s16, %s342_s0 }
   0x6   :  { %p199_p2 = pnand %p197_p1, %p194_p0 }
   0x8   :  { %202 = shalt.err (!%p199_p2)
}
   0x9   :  { %s203_s21 = scalar_lea.vmem %s17_s13, 256  ;;  %p208_p4 = scmp.lt.s32.totalorder %s17_s13, %s17_s13 }
   0xa   :  { %p204_p3 = scmp.ne.s32.totalorder %s17_s13, %s203_s21  ;;  %p209_p5 = scmp.lt.s32.totalorder %s203_s21, %s203_s21 }
   0xc   :  { %p210_p6 = por %p209_p5, %p208_p4 }
   0xe   :  { %p211_p7 = pnand %p210_p6, %p204_p3 }
  0x10   :  { %214 = shalt.err (!%p211_p7)
}
  0x11   :  { %s266_s22 = smov 128   ;;  %s267_s23 = smov 8  }
  0x12   :  { %22 = dma.hbm_to_vmem [thread:$0]  %s342_s0, 256, %s17_s13, [#allocation3], %s266_s22, %s266_s22, %s267_s23  }
  0x13   :  { %s268_s26 = smov [#allocation5]   ;;  %s215_s30 = scalar_lea.hbm %s343_s1, 512 }
  0x14   :  { %s28_s27 = sshll.u32 %s268_s26, 4  ;;  %p216_p8 = scmp.ne.s32.totalorder %s343_s1, %s215_s30  ;;  %s29_s27 = int_to_ptr.vmem [resolvable:$true] %s28_s27 }
  0x15   :  { %p219_p9 = scmp.lt.u32.totalorder %s215_s30, %s343_s1 }
  0x17   :  { %p221_p10 = pnand %p219_p9, %p216_p8 }
  0x19   :  { %224 = shalt.err (!%p221_p10)
}
  0x1a   :  { %s225_s8 = scalar_lea.vmem %s29_s27, 512  ;;  %p230_p12 = scmp.lt.s32.totalorder %s29_s27, %s29_s27 }
  0x1b   :  { %p226_p11 = scmp.ne.s32.totalorder %s29_s27, %s225_s8  ;;  %p231_p13 = scmp.lt.s32.totalorder %s225_s8, %s225_s8 }
  0x1d   :  { %p232_p0 = por %p231_p13, %p230_p12 }
  0x1f   :  { %p233_p1 = pnand %p232_p0, %p226_p11 }
  0x21   :  { %236 = shalt.err (!%p233_p1)
}
  0x22   :  { %34 = dma.hbm_to_vmem [thread:$0]  %s343_s1, 512, %s29_s27, [#allocation6], %s266_s22, %s266_s22, %s267_s23  }
  0x23   :  { %259 = dma.done.wait [#allocation3], 256  }
  0x24   :  { %260 = vsyncadd [#allocation3], 4294967040 }
  0x25   :  { %261 = dma.done.wait [#allocation6], 512  }
  0x26   :  { %262 = vsyncadd [#allocation6], 4294966784  ;;  %vm56_vm0 = vcmask 261120   ;;  %v45_v0 = vld [vmem:[#allocation5] sm:$0xff]  ;;  %v46_v1 = vld [vmem:[#allocation5 + $0x8] sm:$0xff]  ;;  %s269_s11 = smov [#allocation7]  }
  0x27   :  { %v47_v2 = vld [vmem:[#allocation5 + $0x10] sm:$0xff]  ;;  %v180_v3 = vpack.c.bf16 %v46_v1, %v45_v0  ;;  %v48_v4 = vld [vmem:[#allocation5 + $0x18] sm:$0xff]  ;;  %s147_s12 = sshll.u32 %s269_s11, 4  ;;  %s148_s12 = int_to_ptr.vmem [resolvable:$true] %s147_s12 }
  0x28   :  { %v43_v5 = vld [vmem:[#allocation2] sm:$0xff]  ;;  %v184_v6 = vpack.c.bf16 %v48_v4, %v47_v2  ;;  %v44_v7 = vld [vmem:[#allocation2 + $0x8] sm:$0xff]  ;;  %s237_s13 = scalar_lea.vmem %s148_s12, 256  ;;  %p242_p3 = scmp.lt.s32.totalorder %s148_s12, %s148_s12 }
  0x29   :  { %177 = vmatprep.mubr.msk.f32.mxu0 %vm56_vm0, %v43_v5  ;;  %181 = vmatprep.subr.bf16.mxu0 %v180_v3  ;;  %v160_v8 = vld [vmem:[%s344_s2] ss:$0 sm:$0xff]  ;;  %p238_p2 = scmp.ne.s32.totalorder %s148_s12, %s237_s13  ;;  %p243_p4 = scmp.lt.s32.totalorder %s237_s13, %s237_s13 }
  0x2a   :  { %183 = vmatpush3.bf16.msra.mxu0 %v180_v3 }
  0x2b   :  { %185 = vmatprep.subr.bf16.mxu0 %v184_v6  ;;  %p244_p5 = por %p243_p4, %p242_p3 }
  0x2d   :  { %p245_p6 = pnand %p244_p5, %p238_p2 }
  0x2e   :  { %187 = vmatpush3.bf16.msra.mxu0 %v184_v6 }
  0x31   :  { %178 = vmatmul.mubr.msk.f32.vlgmr.msra.gmra.mrb[0].mxu0 %vm56_vm0, %v44_v7 }
 0x104   :  { %v179_v9 = vpop.f32.mrb[0].mxu0 }
 0x105   :  { %v135_v10 = vadd.f32 %v179_v9, %v160_v8  ;;  %v129_v11 = vpop.f32.mrb[1].mxu0 }
 0x106   :  { %v130_v12 = vadd.f32 %v160_v8, %v129_v11 }
 0x107   :  { %v139_v13 = vadd.f32 %v135_v10, %v44_v7 }
 0x108   :  { %v138_v14 = vadd.f32 %v130_v12, %v43_v5 }
 0x109   :  { %141 = vst.msk [vmem:[#allocation7 + $0x8] sm:$0xff] %vm56_vm0, %v139_v13 }
 0x10a   :  { %140 = vst.msk [vmem:[#allocation7] sm:$0xff] %vm56_vm0, %v138_v14 }
 0x10b   :  { %248 = shalt.err (!%p245_p6)
}
 0x10c   :  { %s249_s15 = scalar_lea.hbm %s345_s3, 256 }
 0x10d   :  { %p250_p7 = scmp.ne.s32.totalorder %s345_s3, %s249_s15  ;;  %p253_p8 = scmp.lt.u32.totalorder %s249_s15, %s345_s3 }
 0x10f   :  { %p255_p9 = pnand %p253_p8, %p250_p7 }
 0x111   :  { %258 = shalt.err (!%p255_p9)
}
 0x112   :  { %153 = dma.vmem_to_hbm [thread:$0]  %s148_s12, 256, %s345_s3, [#allocation4], %s266_s22, %s266_s22, %s267_s23  }
 0x113   :  { %263 = dma.done.wait [#allocation4], 256  }
 0x114   :  { %264 = vsyncadd [#allocation4], 4294967040 }
 0x115   :  { %157 = vsyncpa [#allocation3], 1 }
 0x116   :  { %158 = vsyncpa [#allocation6], 1 }
 0x117   :  { %159 = vsyncpa [#allocation4], 1 }

</bundles_post_ra>
